<compile_context>
chip_gen: v7x
topology: tpu7x:2x2x1
jax: 0.10.0
libtpu: 0.0.40
codegen_flags: <defaults>
</compile_context>

<pallas_src>
import functools
import math

import jax
import jax.numpy as jnp
import numpy as np
from jax.experimental import pallas as pl
from jax.experimental.pallas import tpu as pltpu


def _round_up(a, b):
    return -(-a // b) * b


def _corr2d_kernel(w_ref, b_ref, *refs, kh, kw, tm, hh, sb, wo, wp):
    """Computes one (tm, wo) output row-tile of corr2d(x, w) + b."""
    use_scratch = (kh > 1) or (kw > 1)
    if kh > 1:
        xc_ref, xh_ref, o_ref, x_scr = refs
    elif use_scratch:
        xc_ref, o_ref, x_scr = refs
        xh_ref = None
    else:
        xc_ref, o_ref = refs

    # Hoist all SMEM scalar reads out of the (trace-time unrolled) tap loops.
    w = [[w_ref[i * kw + j] for j in range(kw)] for i in range(kh)]
    bias = b_ref[0]

    if not use_scratch:
        # 1x1 kernel: pure scale + shift, no staging needed.
        o_ref[...] = w[0][0] * xc_ref[...] + bias
        return

    # Stage the current rows (plus the minimal sublane-aligned row halo) into
    # one VMEM scratch so every tap below is a plain static ref slice — no
    # jnp.concatenate and no full-tile value temporaries.
    x_scr[0:tm, 0:wp] = xc_ref[...]
    if kh > 1:
        x_scr[tm:tm + hh, 0:wp] = xh_ref[...]
    # Columns [wp, w_scr) of the scratch are never written; whatever they hold
    # only ever reaches output columns >= ow, which the wrapper slices away.

    # Process the tile in (sb, wo) row sub-blocks: acc + one lane/sublane
    # shifted tap stay in vregs, and each sub-block ends with a single
    # lane-dense unmasked store to the output block.
    for r0 in range(0, tm, sb):
        acc = w[0][0] * x_scr[r0:r0 + sb, 0:wo]            # first tap inits acc
        for i in range(kh):
            for j in range(kw):
                if i == 0 and j == 0:
                    continue
                acc = acc + w[i][j] * x_scr[r0 + i:r0 + i + sb, j:j + wo]
        o_ref[r0:r0 + sb, :] = acc + bias


def conv2d_forward(x, weight, bias, *, tile_rows=None, vmem_budget_bytes=28 << 20):
    """Equivalent of Conv2D.forward: corr2d(x, weight) + bias ("valid" corr)."""
    x = jnp.asarray(x, jnp.float32)
    weight = jnp.asarray(weight, jnp.float32)
    bias = jnp.asarray(bias, jnp.float32).reshape((1,))

    H, W = x.shape
    kh, kw = weight.shape
    oh, ow = H - kh + 1, W - kw + 1
    assert oh >= 1 and ow >= 1, "kernel larger than input"

    # Lane-dense block widths (multiples of 128). The HBM-side input carries
    # only round_up(W, 128) columns — no extra 128-lane tap stripe.
    wp = _round_up(W, 128)                     # input block / padded-input width
    wo = _round_up(ow, 128)                    # output block width
    # The VMEM scratch gains just enough pad columns for the kw-1 shifted taps.
    w_scr = wo + (_round_up(kw - 1, 128) if kw > 1 else 0)
    assert w_scr >= wp

    # Minimal sublane-aligned row halo for kh > 1.
    hh = _round_up(kh - 1, 8) if kh > 1 else 0

    # Row sub-block: keep one (sb, wo) f32 value at ~64 KiB (16 vregs).
    sb = max(8, min(128, (16384 // wo) // 8 * 8))

    # tm must split into whole sub-blocks and (kh > 1) whole halo blocks.
    m = sb if hh == 0 else math.lcm(sb, hh)

    # Row tile from a chip-safe VMEM budget: double-buffered input + output
    # blocks plus the single staging scratch, all f32.
    bytes_per_row = 4 * (2 * wp + 2 * wo + w_scr)
    tm_budget = max(m, (vmem_budget_bytes // bytes_per_row) // m * m)
    # Keep >= 2 row tiles when the image allows it so the "parallel" grid axis
    # can shard across both v7x TensorCores (no effect on v5e/v6e).
    tm_two = _round_up(-(-oh // 2), m)
    if tile_rows is None:
        tm = min(tm_budget, tm_two, 32 * sb)   # 32*sb bounds the unrolled loop
    else:
        tm = tile_rows
    tm = _round_up(max(tm, m), m)
    tm = min(tm, _round_up(oh, m))

    num_row_tiles = -(-oh // tm)
    oh_pad = num_row_tiles * tm
    h_pad = oh_pad + hh

    # Zero padding is only ever read by output rows/cols that are sliced away.
    if (H, W) == (h_pad, wp):
        x_pad = x                              # skip the extra HBM pad pass
    else:
        x_pad = jnp.pad(x, ((0, h_pad - H), (0, wp - W)))

    kernel = functools.partial(_corr2d_kernel, kh=kh, kw=kw, tm=tm, hh=hh,
                               sb=sb, wo=wo, wp=wp)

    in_specs = [
        pl.BlockSpec(memory_space=pltpu.SMEM),               # flat weights
        pl.BlockSpec(memory_space=pltpu.SMEM),               # bias
        pl.BlockSpec((tm, wp), lambda r: (r, 0)),             # current rows
    ]
    args = [weight.reshape(-1), bias, x_pad]
    if kh > 1:
        hbpt = tm // hh                                       # halo blocks / tile
        in_specs.append(pl.BlockSpec((hh, wp), lambda r: ((r + 1) * hbpt, 0)))
        args.append(x_pad)

    scratch_shapes = []
    if kh > 1 or kw > 1:
        scratch_shapes.append(pltpu.VMEM((tm + hh, w_scr), jnp.float32))

    out = pl.pallas_call(
        kernel,
        out_shape=jax.ShapeDtypeStruct((oh_pad, wo), jnp.float32),
        grid=(num_row_tiles,),
        in_specs=in_specs,
        out_specs=pl.BlockSpec((tm, wo), lambda r: (r, 0)),
        scratch_shapes=scratch_shapes,
        compiler_params=pltpu.CompilerParams(
            dimension_semantics=("parallel",),
            vmem_limit_bytes=48 * 1024 * 1024),
        cost_estimate=pl.CostEstimate(
            flops=2 * kh * kw * oh * ow,
            transcendentals=0,
            bytes_accessed=4 * (H * W + oh * ow)),
    )(*args)

    # TODO(synk): fold this valid-region slice into the consumer to avoid one
    # extra HBM pass over the output.
    return out[:oh, :ow]


def _corr2d_ref(x, k):
    """Pure-numpy reference for 'valid' 2-D cross-correlation."""
    x = np.asarray(x, np.float64)
    k = np.asarray(k, np.float64)
    kh, kw = k.shape
    oh, ow = x.shape[0] - kh + 1, x.shape[1] - kw + 1
    out = np.zeros((oh, ow), np.float64)
    for i in range(kh):
        for j in range(kw):
            out += k[i, j] * x[i:i + oh, j:j + ow]
    return out


if __name__ == "__main__":
    key = jax.random.PRNGKey(0)
    k_w1, k_x1, k_w2, k_x2 = jax.random.split(key, 4)

    # Case 1: the reference-script configuration — x (6, 8), kernel_size (1, 2),
    # weight ~ U[0, 1) (torch.rand), bias zeros.
    weight1 = jax.random.uniform(k_w1, (1, 2), dtype=jnp.float32)
    bias1 = jnp.zeros((1,), dtype=jnp.float32)
    x1 = jax.random.normal(k_x1, (6, 8), dtype=jnp.float32)

    out1 = jax.block_until_ready(conv2d_forward(x1, weight1, bias1))
    ref1 = _corr2d_ref(x1, weight1) + float(bias1[0])
    assert out1.shape == (6, 7), out1.shape
    np.testing.assert_allclose(np.asarray(out1), ref1, rtol=1e-5, atol=1e-5)

    # Case 2: exercises the general path — row halo (kh > 1), a 2-step grid,
    # lane padding for a non-multiple-of-128 width, and a nonzero bias.
    weight2 = jax.random.uniform(k_w2, (2, 3), dtype=jnp.float32)
    bias2 = jnp.full((1,), 0.25, dtype=jnp.float32)
    x2 = jax.random.normal(k_x2, (120, 150), dtype=jnp.float32)

    out2 = jax.block_until_ready(conv2d_forward(x2, weight2, bias2))
    ref2 = _corr2d_ref(x2, weight2) + float(bias2[0])
    assert out2.shape == (119, 148), out2.shape
    np.testing.assert_allclose(np.asarray(out2), ref2, rtol=1e-5, atol=1e-5)

    print("KERNEL_OK")
</pallas_src>

<mosaic_0001>
module attributes {stable_mosaic.version = 11 : i64} {
  func.func @_corr2d_kernel(%arg0: i32, %arg1: memref<2xf32, #tpu.memory_space<smem>>, %arg2: memref<1xf32, #tpu.memory_space<smem>>, %arg3: memref<128x128xf32, #tpu.memory_space<vmem>>, %arg4: memref<128x128xf32, #tpu.memory_space<vmem>>, %arg5: memref<128x256xf32, #tpu.memory_space<vmem>>) attributes {dimension_semantics = [#tpu.dimension_semantics<parallel>], iteration_bounds = array<i64: 1>, scalar_prefetch = 0 : i64, scratch_operands = 1 : i64, tpu.core_type = #tpu.core_type<tc>, window_params = [{transform_indices = @transform_0, window_bounds = array<i64: 2>}, {transform_indices = @transform_1, window_bounds = array<i64: 1>}, {transform_indices = @transform_2, window_bounds = array<i64: 128, 128>}, {transform_indices = @transform_3, window_bounds = array<i64: 128, 128>}]} {
    %c0 = arith.constant 0 : index
    %0 = memref.load %arg1[%c0] : memref<2xf32, #tpu.memory_space<smem>>
    %c1 = arith.constant 1 : index
    %1 = memref.load %arg1[%c1] : memref<2xf32, #tpu.memory_space<smem>>
    %c0_0 = arith.constant 0 : index
    %2 = memref.load %arg2[%c0_0] : memref<1xf32, #tpu.memory_space<smem>>
    %c0_1 = arith.constant 0 : index
    %c0_2 = arith.constant 0 : index
    %3 = vector.load %arg3[%c0_1, %c0_2] : memref<128x128xf32, #tpu.memory_space<vmem>>, vector<128x128xf32>
    %c0_3 = arith.constant 0 : index
    %c0_4 = arith.constant 0 : index
    %4 = vector.load %arg5[%c0_3, %c0_4] : memref<128x256xf32, #tpu.memory_space<vmem>>, vector<128x128xf32>
    tpu.vector_store %arg5[%c0_3, %c0_4], %3 {strides = array<i32>} : memref<128x256xf32, #tpu.memory_space<vmem>>, vector<128x128xf32>,
    %c0_5 = arith.constant 0 : index
    %c0_6 = arith.constant 0 : index
    %5 = vector.load %arg5[%c0_5, %c0_6] : memref<128x256xf32, #tpu.memory_space<vmem>>, vector<128x128xf32>
    %6 = vector.broadcast %0 : f32 to vector<128x128xf32>
    %7 = arith.mulf %6, %5 : vector<128x128xf32>
    %c0_7 = arith.constant 0 : index
    %c1_8 = arith.constant 1 : index
    %8 = vector.load %arg5[%c0_7, %c1_8] : memref<128x256xf32, #tpu.memory_space<vmem>>, vector<128x128xf32>
    %9 = vector.broadcast %1 : f32 to vector<128x128xf32>
    %10 = arith.mulf %9, %8 : vector<128x128xf32>
    %11 = arith.addf %7, %10 : vector<128x128xf32>
    %12 = vector.broadcast %2 : f32 to vector<128x128xf32>
    %13 = arith.addf %11, %12 : vector<128x128xf32>
    %c0_9 = arith.constant 0 : index
    %c0_10 = arith.constant 0 : index
    %14 = vector.load %arg4[%c0_9, %c0_10] : memref<128x128xf32, #tpu.memory_space<vmem>>, vector<128x128xf32>
    tpu.vector_store %arg4[%c0_9, %c0_10], %13 {strides = array<i32>} : memref<128x128xf32, #tpu.memory_space<vmem>>, vector<128x128xf32>,
    return
  }
  func.func @transform_0(%arg0: i32) -> i32 {
    %c0_i32 = arith.constant 0 : i32
    %c0_i32_0 = arith.constant 0 : i32
    return %c0_i32 : i32
  }
  func.func @transform_1(%arg0: i32) -> i32 {
    %c0_i32 = arith.constant 0 : i32
    %c0_i32_0 = arith.constant 0 : i32
    return %c0_i32 : i32
  }
  func.func @transform_2(%arg0: i32) -> (i32, i32) {
    %c0_i32 = arith.constant 0 : i32
    %c0_i32_0 = arith.constant 0 : i32
    return %arg0, %c0_i32 : i32, i32
  }
  func.func @transform_3(%arg0: i32) -> (i32, i32) {
    %c0_i32 = arith.constant 0 : i32
    %c0_i32_0 = arith.constant 0 : i32
    return %arg0, %c0_i32 : i32, i32
  }
}

</mosaic_0001>

<bundles_post_ra>
// kernel: tpu_custom_call.1
= control target key start
LH: loop header
LB: loop body
LE: loop exit
PB: predicated region body
PF: predicated region fallthrough
CT: control target
= control target key end

     0   :  { %9 = vsyncpa [#allocation7], 0  ;;  %s685_s0 = inlined_call_operand.vmem [shape: f32[2], index: 0, kind: input, shape index: {}]   ;;  %s686_s1 = inlined_call_operand.<no memory space> [shape: f32[1], index: 1, kind: input, shape index: {}]   ;;  %s687_s2 = inlined_call_operand.hbm [shape: f32[128,128], index: 2, kind: input, shape index: {}]   ;;  %s688_s3 = inlined_call_operand.hbm [shape: f32[128,128], index: 3, kind: output, shape index: {}]  }
   0x1   :  { %10 = vsyncpa [#allocation5], 0 }
   0x2   :  { %11 = vsyncpa [#allocation6], 0  ;;  %s18_s14 = sshll.u32 %s685_s0, 4  ;;  %s19_s14 = int_to_ptr.vmem [resolvable:$true] %s18_s14 }
   0x3   :  { %s379_s15 = scalar_lea.vmem %s19_s14, 16  ;;  %p384_p1 = scmp.lt.s32.totalorder %s19_s14, %s19_s14 }
   0x4   :  { %p380_p0 = scmp.ne.s32.totalorder %s19_s14, %s379_s15  ;;  %p385_p2 = scmp.lt.s32.totalorder %s379_s15, %s379_s15 }
   0x6   :  { %p386_p3 = por %p385_p2, %p384_p1 }
   0x8   :  { %p387_p4 = pnand %p386_p3, %p380_p0 }
   0xa   :  { %390 = shalt.err (!%p387_p4)
}
   0xb   :  { %s441_s16 = smov [#allocation4]   ;;  %s442_s17 = smov [#allocation8]  }
   0xc   :  { %21 = dma.vmem_to_smem %s19_s14, 16, %s441_s16, [#allocation7]  }
   0xd   :  { %s29_s18 = sshll.u32 %s442_s17, 4  ;;  %s391_s21 = scalar_lea.hbm %s687_s2, 2048  ;;  %s30_s18 = int_to_ptr.vmem [resolvable:$true] %s29_s18 }
   0xe   :  { %p392_p5 = scmp.ne.s32.totalorder %s687_s2, %s391_s21  ;;  %p395_p6 = scmp.lt.u32.totalorder %s391_s21, %s687_s2 }
  0x10   :  { %p397_p7 = pnand %p395_p6, %p392_p5 }
  0x12   :  { %400 = shalt.err (!%p397_p7)
}
  0x13   :  { %s401_s25 = scalar_lea.vmem %s30_s18, 2048  ;;  %p406_p9 = scmp.lt.s32.totalorder %s30_s18, %s30_s18 }
  0x14   :  { %p402_p8 = scmp.ne.s32.totalorder %s30_s18, %s401_s25  ;;  %p407_p10 = scmp.lt.s32.totalorder %s401_s25, %s401_s25 }
  0x16   :  { %p408_p11 = por %p407_p10, %p406_p9 }
  0x18   :  { %p409_p12 = pnand %p408_p11, %p402_p8 }
  0x1a   :  { %412 = shalt.err (!%p409_p12)
}
  0x1b   :  { %s443_s26 = smov 128   ;;  %s444_s27 = smov 8  }
  0x1c   :  { %35 = dma.hbm_to_vmem [thread:$0]  %s687_s2, 2048, %s30_s18, [#allocation5], %s443_s26, %s443_s26, %s444_s27  }
  0x1d   :  { %435 = dma.done.wait [#allocation7], 16  }
  0x1e   :  { %436 = vsyncadd [#allocation7], 4294967280 }
  0x1f   :  { %437 = dma.done.wait [#allocation5], 2048  }
  0x20   :  { %438 = vsyncadd [#allocation5], 4294965248 }
  0x21   :  { %42 = sfence }
  0x22   :  { %s372_s30 = sld [smem:[#allocation4 + $0x1]]  ;;  %v485_v0 = vld [vmem:[#allocation8] sm:$0xff]  ;;  %v487_v1 = vld [vmem:[#allocation8 + $0x8] sm:$0xff]  ;;  %v489_v2 = vld [vmem:[#allocation8 + $0x10] sm:$0xff]  ;;  %s445_s2 = smov 127   ;;  %vm272_vm0 = vcmask 1039360  }
  0x23   :  { %v491_v3 = vld [vmem:[#allocation8 + $0x18] sm:$0xff]  ;;  %v493_v4 = vld [vmem:[#allocation8 + $0x20] sm:$0xff]  ;;  %v495_v5 = vld [vmem:[#allocation8 + $0x28] sm:$0xff]  ;;  %s43_s4 = sld [smem:[#allocation4]] }
  0x24   :  { %v114_v6 = vld [vmem:[#allocation2 + $0x18] sm:$0xff]  ;;  %v112_v7 = vld [vmem:[#allocation2 + $0x8] sm:$0xff]  ;;  %v497_v8 = vld [vmem:[#allocation8 + $0x30] sm:$0xff] }
  0x25   :  { %v499_v9 = vld [vmem:[#allocation8 + $0x38] sm:$0xff]  ;;  %v501_v10 = vld [vmem:[#allocation8 + $0x40] sm:$0xff]  ;;  %v116_v12 = vld [vmem:[#allocation2 + $0x28] sm:$0xff] }
  0x26   :  { %v505_v13 = vld [vmem:[#allocation8 + $0x48] sm:$0xff]  ;;  %v509_v16 = vld [vmem:[#allocation8 + $0x50] sm:$0xff]  ;;  %v511_v17 = vld [vmem:[#allocation8 + $0x58] sm:$0xff] }
  0x27   :  { %v513_v18 = vld [vmem:[#allocation8 + $0x60] sm:$0xff]  ;;  %v520_v21 = vld [vmem:[#allocation8 + $0x68] sm:$0xff]  ;;  %v522_v22 = vld [vmem:[#allocation8 + $0x70] sm:$0xff] }
  0x28   :  { %v503_v11 = vstv %s372_s30  ;;  %v524_v23 = vld [vmem:[#allocation8 + $0x78] sm:$0xff]  ;;  %v120_v29 = vld [vmem:[#allocation2 + $0x48] sm:$0xff] }
  0x29   :  { %v147_v14 = vmul.f32 %v503_v11, %v114_v6  ;;  %v145_v15 = vmul.f32 %v503_v11, %v112_v7  ;;  %v149_v19 = vmul.f32 %v503_v11, %v116_v12  ;;  %v144_v20 = vmul.f32 %v503_v11, %v485_v0  ;;  %v118_v26 = vld [vmem:[#allocation2 + $0x38] sm:$0xff]  ;;  %v124_v35 = vld [vmem:[#allocation2 + $0x68] sm:$0xff] }
  0x2a   :  { %v146_v24 = vmul.f32 %v503_v11, %v487_v1  ;;  %v148_v25 = vmul.f32 %v503_v11, %v489_v2  ;;  %v151_v27 = vmul.f32 %v503_v11, %v118_v26  ;;  %v150_v28 = vmul.f32 %v503_v11, %v491_v3  ;;  %v122_v32 = vld [vmem:[#allocation2 + $0x58] sm:$0xff]  ;;  %v128_v41 = vld [vmem:[#allocation2 + $0x88] sm:$0xff] }
  0x2b   :  { %214 = vrot.lane.b32.xlu1 %v147_v14, %s445_s2  ;;  %210 = vrot.lane.b32.xlu0 %v145_v15, %s445_s2  ;;  %v153_v30 = vmul.f32 %v503_v11, %v120_v29  ;;  %v152_v31 = vmul.f32 %v503_v11, %v493_v4  ;;  %v155_v33 = vmul.f32 %v503_v11, %v122_v32  ;;  %v126_v38 = vld [vmem:[#allocation2 + $0x78] sm:$0xff]  ;;  %v132_v47 = vld [vmem:[#allocation2 + $0xa8] sm:$0xff]  ;;  %v599_v7 = vstv %s43_s4 }
  0x2c   :  { %v154_v34 = vmul.f32 %v503_v11, %v495_v5  ;;  %v157_v36 = vmul.f32 %v503_v11, %v124_v35  ;;  %v156_v37 = vmul.f32 %v503_v11, %v497_v8  ;;  %v159_v39 = vmul.f32 %v503_v11, %v126_v38  ;;  %v130_v44 = vld [vmem:[#allocation2 + $0x98] sm:$0xff]  ;;  %v136_v53 = vld [vmem:[#allocation2 + $0xc8] sm:$0xff] }
  0x2d   :  { %v158_v40 = vmul.f32 %v503_v11, %v499_v9  ;;  %v161_v42 = vmul.f32 %v503_v11, %v128_v41  ;;  %v160_v43 = vmul.f32 %v503_v11, %v501_v10  ;;  %v163_v45 = vmul.f32 %v503_v11, %v130_v44  ;;  %v134_v50 = vld [vmem:[#allocation2 + $0xb8] sm:$0xff]  ;;  %v140_v59 = vld [vmem:[#allocation2 + $0xe8] sm:$0xff] }
  0x2e   :  { %v162_v46 = vmul.f32 %v503_v11, %v505_v13  ;;  %v165_v48 = vmul.f32 %v503_v11, %v132_v47  ;;  %v164_v49 = vmul.f32 %v503_v11, %v509_v16  ;;  %v167_v51 = vmul.f32 %v503_v11, %v134_v50  ;;  %v138_v56 = vld [vmem:[#allocation2 + $0xd8] sm:$0xff] }
  0x2f   :  { %218 = vrot.lane.b32.xlu1 %v149_v19, %s445_s2  ;;  %208 = vrot.lane.b32.xlu0 %v144_v20, %s445_s2  ;;  %v166_v52 = vmul.f32 %v503_v11, %v511_v17  ;;  %v169_v54 = vmul.f32 %v503_v11, %v136_v53  ;;  %v168_v55 = vmul.f32 %v503_v11, %v513_v18  ;;  %v142_v62 = vld [vmem:[#allocation2 + $0xf8] sm:$0xff] }
  0x30   :  { %v171_v57 = vmul.f32 %v503_v11, %v138_v56  ;;  %v170_v58 = vmul.f32 %v503_v11, %v520_v21  ;;  %v173_v60 = vmul.f32 %v503_v11, %v140_v59  ;;  %v172_v61 = vmul.f32 %v503_v11, %v522_v22 }
  0x31   :  { %v175_v63 = vmul.f32 %v503_v11, %v142_v62  ;;  %v174_v6 = vmul.f32 %v503_v11, %v524_v23  ;;  %v95_v15 = vmul.f32 %v599_v7, %v485_v0  ;;  %v96_v26 = vmul.f32 %v599_v7, %v487_v1 }
  0x32   :  { %v100_v44 = vmul.f32 %v599_v7, %v495_v5  ;;  %v102_v5 = vmul.f32 %v599_v7, %v499_v9  ;;  %v104_v9 = vmul.f32 %v599_v7, %v505_v13  ;;  %v106_v13 = vmul.f32 %v599_v7, %v511_v17 }
  0x33   :  { %212 = vrot.lane.b32.xlu1 %v146_v24, %s445_s2  ;;  %216 = vrot.lane.b32.xlu0 %v148_v25, %s445_s2  ;;  %v606_v24 = vstv %s686_s1  ;;  %v108_v17 = vmul.f32 %v599_v7, %v520_v21  ;;  %v110_v21 = vmul.f32 %v599_v7, %v524_v23  ;;  %s446_s1 = smov [#allocation9]  }
  0x34   :  { %s359_s7 = sshll.u32 %s446_s1, 4  ;;  %s360_s7 = int_to_ptr.vmem [resolvable:$true] %s359_s7 }
  0x35   :  { %s413_s8 = scalar_lea.vmem %s360_s7, 2048  ;;  %p418_p0 = scmp.lt.s32.totalorder %s360_s7, %s360_s7 }
  0x36   :  { %p414_p13 = scmp.ne.s32.totalorder %s360_s7, %s413_s8  ;;  %p419_p1 = scmp.lt.s32.totalorder %s413_s8, %s413_s8 }
  0x37   :  { %222 = vrot.lane.b32.xlu1 %v151_v27, %s445_s2  ;;  %220 = vrot.lane.b32.xlu0 %v150_v28, %s445_s2  ;;  %v97_v27 = vmul.f32 %v599_v7, %v489_v2 }
  0x38   :  { %p420_p2 = por %p419_p1, %p418_p0 }
  0x3a   :  { %p421_p3 = pnand %p420_p2, %p414_p13 }
  0x3b   :  { %226 = vrot.lane.b32.xlu1 %v153_v30, %s445_s2  ;;  %224 = vrot.lane.b32.xlu0 %v152_v31, %s445_s2 }
  0x3f   :  { %230 = vrot.lane.b32.xlu1 %v155_v33, %s445_s2  ;;  %228 = vrot.lane.b32.xlu0 %v154_v34, %s445_s2  ;;  %v98_v34 = vmul.f32 %v599_v7, %v491_v3 }
  0x43   :  { %234 = vrot.lane.b32.xlu1 %v157_v36, %s445_s2  ;;  %232 = vrot.lane.b32.xlu0 %v156_v37, %s445_s2 }
  0x47   :  { %238 = vrot.lane.b32.xlu1 %v159_v39, %s445_s2  ;;  %236 = vrot.lane.b32.xlu0 %v158_v40, %s445_s2  ;;  %v99_v39 = vmul.f32 %v599_v7, %v493_v4  ;;  %v101_v4 = vmul.f32 %v599_v7, %v497_v8  ;;  %v103_v8 = vmul.f32 %v599_v7, %v501_v10 }
  0x48   :  { %v105_v10 = vmul.f32 %v599_v7, %v509_v16  ;;  %v107_v16 = vmul.f32 %v599_v7, %v513_v18  ;;  %v109_v18 = vmul.f32 %v599_v7, %v522_v22 }
  0x4b   :  { %242 = vrot.lane.b32.xlu1 %v161_v42, %s445_s2  ;;  %240 = vrot.lane.b32.xlu0 %v160_v43, %s445_s2 }
  0x4f   :  { %246 = vrot.lane.b32.xlu1 %v163_v45, %s445_s2  ;;  %244 = vrot.lane.b32.xlu0 %v162_v46, %s445_s2 }
  0x53   :  { %250 = vrot.lane.b32.xlu1 %v165_v48, %s445_s2  ;;  %248 = vrot.lane.b32.xlu0 %v164_v49, %s445_s2 }
  0x57   :  { %254 = vrot.lane.b32.xlu1 %v167_v51, %s445_s2  ;;  %252 = vrot.lane.b32.xlu0 %v166_v52, %s445_s2 }
  0x5b   :  { %258 = vrot.lane.b32.xlu1 %v169_v54, %s445_s2  ;;  %256 = vrot.lane.b32.xlu0 %v168_v55, %s445_s2 }
  0x5f   :  { %262 = vrot.lane.b32.xlu1 %v171_v57, %s445_s2  ;;  %260 = vrot.lane.b32.xlu0 %v170_v58, %s445_s2 }
  0x63   :  { %266 = vrot.lane.b32.xlu1 %v173_v60, %s445_s2  ;;  %264 = vrot.lane.b32.xlu0 %v172_v61, %s445_s2 }
  0x67   :  { %270 = vrot.lane.b32.xlu1 %v175_v63, %s445_s2  ;;  %268 = vrot.lane.b32.xlu0 %v174_v6, %s445_s2 }
  0x9d   :  { %v215_v12 = vpop.permute.xlu1 %214  ;;  %v211_v14 = vpop.permute.xlu0 %210 }
  0xa1   :  { %v219_v19 = vpop.permute.xlu1 %218  ;;  %v209_v20 = vpop.permute.xlu0 %208 }
  0xa2   :  { %v273_v11 = vsel %vm272_vm0, %v209_v20, %v211_v14 }
  0xa3   :  { %v305_v25 = vadd.f32 %v273_v11, %v95_v15 }
  0xa5   :  { %v322_v28 = vadd.f32 %v606_v24, %v305_v25  ;;  %v213_v29 = vpop.permute.xlu1 %212  ;;  %v217_v0 = vpop.permute.xlu0 %216 }
  0xa6   :  { %v274_v30 = vsel %vm272_vm0, %v213_v29, %v215_v12  ;;  %v275_v31 = vsel %vm272_vm0, %v217_v0, %v219_v19 }
  0xa7   :  { %338 = vst [vmem:[#allocation9] sm:$0xff] %v322_v28  ;;  %v306_v32 = vadd.f32 %v274_v30, %v96_v26  ;;  %v307_v33 = vadd.f32 %v275_v31, %v97_v27 }
  0xa9   :  { %v323_v35 = vadd.f32 %v606_v24, %v306_v32  ;;  %v324_v1 = vadd.f32 %v606_v24, %v307_v33  ;;  %v223_v36 = vpop.permute.xlu1 %222  ;;  %v221_v2 = vpop.permute.xlu0 %220 }
  0xaa   :  { %v276_v37 = vsel %vm272_vm0, %v221_v2, %v223_v36 }
  0xab   :  { %339 = vst [vmem:[#allocation9 + $0x8] sm:$0xff] %v323_v35  ;;  %340 = vst [vmem:[#allocation9 + $0x10] sm:$0xff] %v324_v1  ;;  %v308_v38 = vadd.f32 %v276_v37, %v98_v34 }
  0xad   :  { %v325_v40 = vadd.f32 %v606_v24, %v308_v38  ;;  %v227_v41 = vpop.permute.xlu1 %226  ;;  %v225_v42 = vpop.permute.xlu0 %224 }
  0xae   :  { %v277_v3 = vsel %vm272_vm0, %v225_v42, %v227_v41 }
  0xaf   :  { %341 = vst [vmem:[#allocation9 + $0x18] sm:$0xff] %v325_v40  ;;  %v309_v43 = vadd.f32 %v277_v3, %v99_v39 }
  0xb1   :  { %v326_v45 = vadd.f32 %v606_v24, %v309_v43  ;;  %v231_v46 = vpop.permute.xlu1 %230  ;;  %v229_v47 = vpop.permute.xlu0 %228 }
  0xb2   :  { %v278_v48 = vsel %vm272_vm0, %v229_v47, %v231_v46 }
  0xb3   :  { %342 = vst [vmem:[#allocation9 + $0x20] sm:$0xff] %v326_v45  ;;  %v310_v49 = vadd.f32 %v278_v48, %v100_v44 }
  0xb5   :  { %v327_v50 = vadd.f32 %v606_v24, %v310_v49  ;;  %v235_v51 = vpop.permute.xlu1 %234  ;;  %v233_v52 = vpop.permute.xlu0 %232 }
  0xb6   :  { %v279_v53 = vsel %vm272_vm0, %v233_v52, %v235_v51 }
  0xb7   :  { %343 = vst [vmem:[#allocation9 + $0x28] sm:$0xff] %v327_v50  ;;  %v311_v54 = vadd.f32 %v279_v53, %v101_v4 }
  0xb9   :  { %v328_v55 = vadd.f32 %v606_v24, %v311_v54  ;;  %v239_v56 = vpop.permute.xlu1 %238  ;;  %v237_v57 = vpop.permute.xlu0 %236 }
  0xba   :  { %v280_v58 = vsel %vm272_vm0, %v237_v57, %v239_v56 }
  0xbb   :  { %344 = vst [vmem:[#allocation9 + $0x30] sm:$0xff] %v328_v55  ;;  %v312_v59 = vadd.f32 %v280_v58, %v102_v5 }
  0xbd   :  { %v329_v60 = vadd.f32 %v606_v24, %v312_v59  ;;  %v243_v61 = vpop.permute.xlu1 %242  ;;  %v241_v62 = vpop.permute.xlu0 %240 }
  0xbe   :  { %v281_v63 = vsel %vm272_vm0, %v241_v62, %v243_v61 }
  0xbf   :  { %345 = vst [vmem:[#allocation9 + $0x38] sm:$0xff] %v329_v60  ;;  %v313_v6 = vadd.f32 %v281_v63, %v103_v8 }
  0xc1   :  { %v330_v12 = vadd.f32 %v606_v24, %v313_v6  ;;  %v247_v14 = vpop.permute.xlu1 %246  ;;  %v245_v15 = vpop.permute.xlu0 %244 }
  0xc2   :  { %v282_v19 = vsel %vm272_vm0, %v245_v15, %v247_v14 }
  0xc3   :  { %346 = vst [vmem:[#allocation9 + $0x40] sm:$0xff] %v330_v12  ;;  %v314_v20 = vadd.f32 %v282_v19, %v104_v9 }
  0xc5   :  { %v331_v11 = vadd.f32 %v606_v24, %v314_v20  ;;  %v251_v25 = vpop.permute.xlu1 %250  ;;  %v249_v26 = vpop.permute.xlu0 %248 }
  0xc6   :  { %v283_v27 = vsel %vm272_vm0, %v249_v26, %v251_v25 }
  0xc7   :  { %347 = vst [vmem:[#allocation9 + $0x48] sm:$0xff] %v331_v11  ;;  %v315_v28 = vadd.f32 %v283_v27, %v105_v10 }
  0xc9   :  { %v332_v29 = vadd.f32 %v606_v24, %v315_v28  ;;  %v255_v0 = vpop.permute.xlu1 %254  ;;  %v253_v30 = vpop.permute.xlu0 %252 }
  0xca   :  { %v284_v31 = vsel %vm272_vm0, %v253_v30, %v255_v0 }
  0xcb   :  { %348 = vst [vmem:[#allocation9 + $0x50] sm:$0xff] %v332_v29  ;;  %v316_v32 = vadd.f32 %v284_v31, %v106_v13 }
  0xcd   :  { %v333_v33 = vadd.f32 %v606_v24, %v316_v32  ;;  %v259_v34 = vpop.permute.xlu1 %258  ;;  %v257_v35 = vpop.permute.xlu0 %256 }
  0xce   :  { %v285_v1 = vsel %vm272_vm0, %v257_v35, %v259_v34 }
  0xcf   :  { %349 = vst [vmem:[#allocation9 + $0x58] sm:$0xff] %v333_v33  ;;  %v317_v36 = vadd.f32 %v285_v1, %v107_v16 }
  0xd1   :  { %v334_v2 = vadd.f32 %v606_v24, %v317_v36  ;;  %v263_v37 = vpop.permute.xlu1 %262  ;;  %v261_v38 = vpop.permute.xlu0 %260 }
  0xd2   :  { %v286_v39 = vsel %vm272_vm0, %v261_v38, %v263_v37 }
  0xd3   :  { %350 = vst [vmem:[#allocation9 + $0x60] sm:$0xff] %v334_v2  ;;  %v318_v40 = vadd.f32 %v286_v39, %v108_v17 }
  0xd5   :  { %v335_v41 = vadd.f32 %v606_v24, %v318_v40  ;;  %v267_v42 = vpop.permute.xlu1 %266  ;;  %v265_v3 = vpop.permute.xlu0 %264 }
  0xd6   :  { %v287_v43 = vsel %vm272_vm0, %v265_v3, %v267_v42 }
  0xd7   :  { %351 = vst [vmem:[#allocation9 + $0x68] sm:$0xff] %v335_v41  ;;  %v319_v44 = vadd.f32 %v287_v43, %v109_v18 }
  0xd9   :  { %v336_v45 = vadd.f32 %v606_v24, %v319_v44  ;;  %v271_v46 = vpop.permute.xlu1 %270  ;;  %v269_v47 = vpop.permute.xlu0 %268 }
  0xda   :  { %v288_v48 = vsel %vm272_vm0, %v269_v47, %v271_v46 }
  0xdb   :  { %352 = vst [vmem:[#allocation9 + $0x70] sm:$0xff] %v336_v45  ;;  %v320_v22 = vadd.f32 %v288_v48, %v110_v21 }
  0xdd   :  { %v337_v49 = vadd.f32 %v606_v24, %v320_v22 }
  0xdf   :  { %353 = vst [vmem:[#allocation9 + $0x78] sm:$0xff] %v337_v49 }
  0xe0   :  { %424 = shalt.err (!%p421_p3)
}
  0xe1   :  { %s425_s11 = scalar_lea.hbm %s688_s3, 2048 }
  0xe2   :  { %p426_p4 = scmp.ne.s32.totalorder %s688_s3, %s425_s11  ;;  %p429_p5 = scmp.lt.u32.totalorder %s425_s11, %s688_s3 }
  0xe4   :  { %p431_p6 = pnand %p429_p5, %p426_p4 }
  0xe6   :  { %434 = shalt.err (!%p431_p6)
}
  0xe7   :  { %365 = dma.vmem_to_hbm [thread:$0]  %s360_s7, 2048, %s688_s3, [#allocation6], %s443_s26, %s443_s26, %s444_s27  }
  0xe8   :  { %439 = dma.done.wait [#allocation6], 2048  }
  0xe9   :  { %440 = vsyncadd [#allocation6], 4294965248 }
  0xea   :  { %369 = vsyncpa [#allocation5], 1 }
  0xeb   :  { %370 = vsyncpa [#allocation6], 1 }
  0xec   :  { %371 = vsyncpa [#allocation7], 1 }

</bundles_post_ra>
